<compile_context>
chip_gen: v5e
topology: v5e:2x2
jax: 0.10.0
libtpu: 0.0.40
codegen_flags: <defaults>
</compile_context>

<pallas_src>
import functools

import jax
import jax.numpy as jnp
from jax.experimental import pallas as pl
from jax.experimental.pallas import tpu as pltpu

LN_EPS = 1e-5  # PyTorch nn.LayerNorm default


# ------------------------------- fused kernel ---------------------------------------
def _conv_encoder_kernel(x_ref, wdw_ref, bdw_ref, wpw_ref, bpw_ref, g_ref,
                         b_ref, o_ref, *, seq_len, ksize):
    xf = x_ref[...]                         # (M, D) f32, M = B_TILE * seq_len
    M, D = xf.shape
    pad = ksize // 2

    # Row index within its batch element (rows are batch-major in the slab).
    lrow = jax.lax.broadcasted_iota(jnp.int32, (M, 1), 0) % seq_len

    # ---- depthwise 1-D conv along L (groups == channels -> elementwise in D) ----
    # Each tap is an XLU sublane roll of the whole slab; the row mask zeroes
    # taps that fall outside [0, seq_len) of their own batch element, which is
    # exactly the conv's zero padding (and prevents cross-batch contamination).
    wdw = wdw_ref[...]                                     # (K, D), loaded once
    dw = jnp.broadcast_to(bdw_ref[...], (M, D))            # depthwise bias
    for j in range(ksize):                                  # unrolled, K = 7
        off = j - pad
        if off == 0:
            tap = xf
        else:
            rolled = pltpu.roll(xf, shift=(-off) % M, axis=0)  # row l -> x[l+off]
            valid = (lrow + off >= 0) & (lrow + off < seq_len)
            tap = jnp.where(valid, rolled, 0.0)
        dw = dw + tap * wdw[j:j + 1, :]

    # ---- pointwise 1x1 conv: one MXU matmul, bf16 operands, f32 accumulation ----
    pw = jnp.dot(dw.astype(jnp.bfloat16), wpw_ref[...],
                 preferred_element_type=jnp.float32) + bpw_ref[...]

    # TODO(synk): nn.Dropout is identity here (eval mode); training-mode random
    # masking would need pltpu.prng_seed / prng_random_bits in-kernel.
    h = jnp.maximum(pw, 0.0) + xf                           # ReLU + residual

    # ---- LayerNorm over channels, single reduction pass ----
    inv_d = 1.0 / D
    mean = jnp.sum(h, axis=-1, keepdims=True) * inv_d
    ex2 = jnp.sum(h * h, axis=-1, keepdims=True) * inv_d
    var = ex2 - mean * mean
    inv = jax.lax.rsqrt(var + LN_EPS)                       # EUP, not sqrt+div
    o_ref[...] = ((h - mean) * inv) * g_ref[...] + b_ref[...]


def conv_encoder_pallas(x, mask, w_dw, b_dw, w_pw, b_pw, gamma, beta):
    """x: (N, L, D) f32.  mask: (N, L) — unused (matches the PyTorch module)."""
    del mask                                 # ConvEncoder.forward ignores it
    N, L, D = x.shape
    K = w_dw.shape[0]

    # Keep sublane extents 8-aligned (unmasked vld/vst); padded rows are zeros,
    # which is exactly the conv's zero padding, and are sliced off afterwards.
    L_pad = -(-L // 8) * 8
    if L_pad != L:
        x = jnp.pad(x, ((0, 0), (0, L_pad - L), (0, 0)))

    # Batch tile: flatten B_TILE samples into the matmul M dimension so the MXU
    # sees M >= 256 when possible; cap rows so double-buffered in+out f32 slabs
    # (4 * M * D * 4B) stay far inside the 32 MiB scoped VMEM limit (v7x-safe).
    max_rows = 2048                          # 2048*128*4B = 1 MiB per buffer
    b_tile = 1
    for bt in range(1, N + 1):
        if N % bt == 0 and bt * L_pad <= max_rows:
            b_tile = bt
            if bt * L_pad >= 256:
                break
    M = b_tile * L_pad

    x2 = x.reshape(N * L_pad, D)             # contiguous in HBM -> free reshape
    wpw_bf16 = w_pw.astype(jnp.bfloat16)     # bf16 MXU operand, half DMA bytes

    kernel = functools.partial(_conv_encoder_kernel, seq_len=L_pad, ksize=K)
    out2 = pl.pallas_call(
        kernel,
        out_shape=jax.ShapeDtypeStruct((N * L_pad, D), jnp.float32),
        grid_spec=pltpu.PrefetchScalarGridSpec(
            num_scalar_prefetch=0,
            grid=(N // b_tile,),
            in_specs=[
                pl.BlockSpec((M, D), lambda n: (n, 0)),    # flattened x slab
                pl.BlockSpec((K, D), lambda n: (0, 0)),    # depthwise weight
                pl.BlockSpec((1, D), lambda n: (0, 0)),    # depthwise bias
                pl.BlockSpec((D, D), lambda n: (0, 0)),    # pointwise weight (bf16)
                pl.BlockSpec((1, D), lambda n: (0, 0)),    # pointwise bias
                pl.BlockSpec((1, D), lambda n: (0, 0)),    # LN gamma
                pl.BlockSpec((1, D), lambda n: (0, 0)),    # LN beta
            ],
            out_specs=pl.BlockSpec((M, D), lambda n: (n, 0)),
        ),
        compiler_params=pltpu.CompilerParams(
            dimension_semantics=("parallel",),   # batch split across TCs (v7x)
            vmem_limit_bytes=32 * 1024 * 1024),  # explicit, safe on v5e/v6e/v7x
    )(x2, w_dw, b_dw, wpw_bf16, b_pw, gamma, beta)

    out = out2.reshape(N, L_pad, D)
    return out[:, :L, :] if L_pad != L else out


# --------------------------- pure-JAX reference for correctness ----------------------
def reference_forward(x, w_dw, b_dw, w_pw, b_pw, gamma, beta):
    N, L, D = x.shape
    K = w_dw.shape[0]
    pad = K // 2
    xp = jnp.pad(x, ((0, 0), (pad, pad), (0, 0)))
    dw = jnp.zeros((N, L, D), jnp.float32)
    for j in range(K):
        dw = dw + xp[:, j:j + L, :] * w_dw[j][None, None, :]
    dw = dw + b_dw[None, :, :]
    pw = jnp.einsum("nld,do->nlo", dw, w_pw) + b_pw[None, :, :]
    h = jnp.maximum(pw, 0.0) + x                     # dropout = identity (eval)
    mean = jnp.mean(h, axis=-1, keepdims=True)
    var = jnp.mean((h - mean) ** 2, axis=-1, keepdims=True)
    return (h - mean) / jnp.sqrt(var + LN_EPS) * gamma[None, :, :] + beta[None, :, :]


# --------------------------------------- main ---------------------------------------
if __name__ == "__main__":
    # ConvEncoder defaults: kernel_size=7, n_filters=128
    N, L, D, K = 2, 16, 128, 7

    key = jax.random.PRNGKey(0)
    ks = jax.random.split(key, 8)

    x = jax.random.normal(ks[0], (N, L, D), jnp.float32)
    mask = jnp.ones((N, L), jnp.float32)                       # unused by the module

    # depthwise weight: torch shape (D, 1, K) -> stored here as (K, D)
    w_dw = jax.random.normal(ks[1], (K, D), jnp.float32) * 0.1
    b_dw = jax.random.normal(ks[2], (1, D), jnp.float32) * 0.1
    # pointwise 1x1 conv weight: torch (D_out, D_in, 1) -> stored as (D_in, D_out)
    w_pw = jax.random.normal(ks[3], (D, D), jnp.float32) * 0.1
    b_pw = jax.random.normal(ks[4], (1, D), jnp.float32) * 0.1
    # LayerNorm affine params
    gamma = 1.0 + jax.random.normal(ks[5], (1, D), jnp.float32) * 0.1
    beta = jax.random.normal(ks[6], (1, D), jnp.float32) * 0.1

    run = jax.jit(lambda xx, mm: conv_encoder_pallas(
        xx, mm, w_dw, b_dw, w_pw, b_pw, gamma, beta))
    out = jax.block_until_ready(run(x, mask))

    ref = jax.block_until_ready(
        reference_forward(x, w_dw, b_dw, w_pw, b_pw, gamma, beta))

    assert out.shape == (N, L, D)
    # bf16 MXU operands (f32 accumulation) vs f32 reference -> ~1e-3 deviations.
    assert jnp.allclose(out, ref, atol=2e-2, rtol=2e-2), (
        float(jnp.max(jnp.abs(out - ref))))

    print("KERNEL_OK")
</pallas_src>

<mosaic_0001>
module attributes {stable_mosaic.version = 11 : i64} {
  func.func @_conv_encoder_kernel(%arg0: i32, %arg1: memref<32x128xf32, #tpu.memory_space<vmem>>, %arg2: memref<7x128xf32, #tpu.memory_space<vmem>>, %arg3: memref<1x128xf32, #tpu.memory_space<vmem>>, %arg4: memref<128x128xbf16, #tpu.memory_space<vmem>>, %arg5: memref<1x128xf32, #tpu.memory_space<vmem>>, %arg6: memref<1x128xf32, #tpu.memory_space<vmem>>, %arg7: memref<1x128xf32, #tpu.memory_space<vmem>>, %arg8: memref<32x128xf32, #tpu.memory_space<vmem>>) attributes {dimension_semantics = [#tpu.dimension_semantics<parallel>], iteration_bounds = array<i64: 1>, scalar_prefetch = 0 : i64, scratch_operands = 0 : i64, tpu.core_type = #tpu.core_type<tc>, window_params = [{transform_indices = @transform_0, window_bounds = array<i64: 32, 128>}, {pipeline_mode = #tpu.pipeline_mode<synchronous>, transform_indices = @transform_1, window_bounds = array<i64: 7, 128>}, {pipeline_mode = #tpu.pipeline_mode<synchronous>, transform_indices = @transform_2, window_bounds = array<i64: 1, 128>}, {pipeline_mode = #tpu.pipeline_mode<synchronous>, transform_indices = @transform_3, window_bounds = array<i64: 128, 128>}, {pipeline_mode = #tpu.pipeline_mode<synchronous>, transform_indices = @transform_4, window_bounds = array<i64: 1, 128>}, {pipeline_mode = #tpu.pipeline_mode<synchronous>, transform_indices = @transform_5, window_bounds = array<i64: 1, 128>}, {pipeline_mode = #tpu.pipeline_mode<synchronous>, transform_indices = @transform_6, window_bounds = array<i64: 1, 128>}, {transform_indices = @transform_7, window_bounds = array<i64: 32, 128>}]} {
    %c0 = arith.constant 0 : index
    %c0_0 = arith.constant 0 : index
    %0 = vector.load %arg1[%c0, %c0_0] : memref<32x128xf32, #tpu.memory_space<vmem>>, vector<32x128xf32>
    %1 = tpu.iota {dimensions = array<i32: 0>} : vector<32x1xi32>
    %c16_i32 = arith.constant 16 : i32
    %c0_i32 = arith.constant 0 : i32
    %2 = arith.cmpi eq, %c16_i32, %c0_i32 : i32
    %c1_i32 = arith.constant 1 : i32
    %3 = arith.select %2, %c1_i32, %c16_i32 : i32
    %4 = vector.broadcast %3 : i32 to vector<32x1xi32>
    %5 = arith.remsi %1, %4 : vector<32x1xi32>
    %c0_i32_1 = arith.constant 0 : i32
    %6 = vector.broadcast %c0_i32_1 : i32 to vector<32x1xi32>
    %7 = arith.cmpi ne, %5, %6 : vector<32x1xi32>
    %c0_i32_2 = arith.constant 0 : i32
    %8 = vector.broadcast %c0_i32_2 : i32 to vector<32x1xi32>
    %9 = arith.cmpi slt, %5, %8 : vector<32x1xi32>
    %c0_i32_3 = arith.constant 0 : i32
    %10 = arith.cmpi slt, %3, %c0_i32_3 : i32
    %11 = vector.broadcast %10 : i1 to vector<32x1xi1>
    %12 = vector.broadcast %11 : vector<32x1xi1> to vector<32x1xi1>
    %13 = arith.xori %9, %12 : vector<32x1xi1>
    %14 = arith.andi %13, %7 : vector<32x1xi1>
    %15 = vector.broadcast %3 : i32 to vector<32x1xi32>
    %16 = arith.addi %5, %15 : vector<32x1xi32>
    %17 = arith.select %14, %16, %5 : vector<32x1xi1>, vector<32x1xi32>
    %c0_4 = arith.constant 0 : index
    %c0_5 = arith.constant 0 : index
    %18 = vector.load %arg2[%c0_4, %c0_5] : memref<7x128xf32, #tpu.memory_space<vmem>>, vector<7x128xf32>
    %c0_6 = arith.constant 0 : index
    %c0_7 = arith.constant 0 : index
    %19 = vector.load %arg3[%c0_6, %c0_7] : memref<1x128xf32, #tpu.memory_space<vmem>>, vector<1x128xf32>
    %20 = vector.shape_cast %19 : vector<1x128xf32> to vector<1x128xf32>
    %21 = vector.broadcast %20 : vector<1x128xf32> to vector<32x128xf32>
    %c3_i32 = arith.constant 3 : i32
    %22 = tpu.dynamic_rotate %0 by %c3_i32 dim 0 : vector<32x128xf32>, i32 -> vector<32x128xf32>
    %c-3_i32 = arith.constant -3 : i32
    %23 = vector.broadcast %c-3_i32 : i32 to vector<32x1xi32>
    %24 = arith.addi %17, %23 : vector<32x1xi32>
    %c0_i32_8 = arith.constant 0 : i32
    %25 = vector.broadcast %c0_i32_8 : i32 to vector<32x1xi32>
    %26 = arith.cmpi sge, %24, %25 : vector<32x1xi32>
    %c-3_i32_9 = arith.constant -3 : i32
    %27 = vector.broadcast %c-3_i32_9 : i32 to vector<32x1xi32>
    %28 = arith.addi %17, %27 : vector<32x1xi32>
    %c16_i32_10 = arith.constant 16 : i32
    %29 = vector.broadcast %c16_i32_10 : i32 to vector<32x1xi32>
    %30 = arith.cmpi slt, %28, %29 : vector<32x1xi32>
    %31 = arith.andi %26, %30 : vector<32x1xi1>
    %cst = arith.constant 0.000000e+00 : f32
    %32 = vector.shape_cast %31 : vector<32x1xi1> to vector<32x1xi1>
    %33 = vector.broadcast %32 : vector<32x1xi1> to vector<32x128xi1>
    %34 = vector.broadcast %cst : f32 to vector<32x128xf32>
    %35 = arith.select %33, %22, %34 : vector<32x128xi1>, vector<32x128xf32>
    %36 = vector.extract_strided_slice %18 {offsets = [0, 0], sizes = [1, 128], strides = [1, 1]} : vector<7x128xf32> to vector<1x128xf32>
    %37 = vector.broadcast %36 : vector<1x128xf32> to vector<32x128xf32>
    %38 = arith.mulf %35, %37 : vector<32x128xf32>
    %39 = arith.addf %21, %38 : vector<32x128xf32>
    %c2_i32 = arith.constant 2 : i32
    %40 = tpu.dynamic_rotate %0 by %c2_i32 dim 0 : vector<32x128xf32>, i32 -> vector<32x128xf32>
    %c-2_i32 = arith.constant -2 : i32
    %41 = vector.broadcast %c-2_i32 : i32 to vector<32x1xi32>
    %42 = arith.addi %17, %41 : vector<32x1xi32>
    %c0_i32_11 = arith.constant 0 : i32
    %43 = vector.broadcast %c0_i32_11 : i32 to vector<32x1xi32>
    %44 = arith.cmpi sge, %42, %43 : vector<32x1xi32>
    %c-2_i32_12 = arith.constant -2 : i32
    %45 = vector.broadcast %c-2_i32_12 : i32 to vector<32x1xi32>
    %46 = arith.addi %17, %45 : vector<32x1xi32>
    %c16_i32_13 = arith.constant 16 : i32
    %47 = vector.broadcast %c16_i32_13 : i32 to vector<32x1xi32>
    %48 = arith.cmpi slt, %46, %47 : vector<32x1xi32>
    %49 = arith.andi %44, %48 : vector<32x1xi1>
    %cst_14 = arith.constant 0.000000e+00 : f32
    %50 = vector.shape_cast %49 : vector<32x1xi1> to vector<32x1xi1>
    %51 = vector.broadcast %50 : vector<32x1xi1> to vector<32x128xi1>
    %52 = vector.broadcast %cst_14 : f32 to vector<32x128xf32>
    %53 = arith.select %51, %40, %52 : vector<32x128xi1>, vector<32x128xf32>
    %54 = vector.extract_strided_slice %18 {offsets = [1, 0], sizes = [1, 128], strides = [1, 1]} : vector<7x128xf32> to vector<1x128xf32>
    %55 = vector.broadcast %54 : vector<1x128xf32> to vector<32x128xf32>
    %56 = arith.mulf %53, %55 : vector<32x128xf32>
    %57 = arith.addf %39, %56 : vector<32x128xf32>
    %c1_i32_15 = arith.constant 1 : i32
    %58 = tpu.dynamic_rotate %0 by %c1_i32_15 dim 0 : vector<32x128xf32>, i32 -> vector<32x128xf32>
    %c-1_i32 = arith.constant -1 : i32
    %59 = vector.broadcast %c-1_i32 : i32 to vector<32x1xi32>
    %60 = arith.addi %17, %59 : vector<32x1xi32>
    %c0_i32_16 = arith.constant 0 : i32
    %61 = vector.broadcast %c0_i32_16 : i32 to vector<32x1xi32>
    %62 = arith.cmpi sge, %60, %61 : vector<32x1xi32>
    %c-1_i32_17 = arith.constant -1 : i32
    %63 = vector.broadcast %c-1_i32_17 : i32 to vector<32x1xi32>
    %64 = arith.addi %17, %63 : vector<32x1xi32>
    %c16_i32_18 = arith.constant 16 : i32
    %65 = vector.broadcast %c16_i32_18 : i32 to vector<32x1xi32>
    %66 = arith.cmpi slt, %64, %65 : vector<32x1xi32>
    %67 = arith.andi %62, %66 : vector<32x1xi1>
    %cst_19 = arith.constant 0.000000e+00 : f32
    %68 = vector.shape_cast %67 : vector<32x1xi1> to vector<32x1xi1>
    %69 = vector.broadcast %68 : vector<32x1xi1> to vector<32x128xi1>
    %70 = vector.broadcast %cst_19 : f32 to vector<32x128xf32>
    %71 = arith.select %69, %58, %70 : vector<32x128xi1>, vector<32x128xf32>
    %72 = vector.extract_strided_slice %18 {offsets = [2, 0], sizes = [1, 128], strides = [1, 1]} : vector<7x128xf32> to vector<1x128xf32>
    %73 = vector.broadcast %72 : vector<1x128xf32> to vector<32x128xf32>
    %74 = arith.mulf %71, %73 : vector<32x128xf32>
    %75 = arith.addf %57, %74 : vector<32x128xf32>
    %76 = vector.extract_strided_slice %18 {offsets = [3, 0], sizes = [1, 128], strides = [1, 1]} : vector<7x128xf32> to vector<1x128xf32>
    %77 = vector.broadcast %76 : vector<1x128xf32> to vector<32x128xf32>
    %78 = arith.mulf %0, %77 : vector<32x128xf32>
    %79 = arith.addf %75, %78 : vector<32x128xf32>
    %c31_i32 = arith.constant 31 : i32
    %80 = tpu.dynamic_rotate %0 by %c31_i32 dim 0 : vector<32x128xf32>, i32 -> vector<32x128xf32>
    %c1_i32_20 = arith.constant 1 : i32
    %81 = vector.broadcast %c1_i32_20 : i32 to vector<32x1xi32>
    %82 = arith.addi %17, %81 : vector<32x1xi32>
    %c0_i32_21 = arith.constant 0 : i32
    %83 = vector.broadcast %c0_i32_21 : i32 to vector<32x1xi32>
    %84 = arith.cmpi sge, %82, %83 : vector<32x1xi32>
    %c1_i32_22 = arith.constant 1 : i32
    %85 = vector.broadcast %c1_i32_22 : i32 to vector<32x1xi32>
    %86 = arith.addi %17, %85 : vector<32x1xi32>
    %c16_i32_23 = arith.constant 16 : i32
    %87 = vector.broadcast %c16_i32_23 : i32 to vector<32x1xi32>
    %88 = arith.cmpi slt, %86, %87 : vector<32x1xi32>
    %89 = arith.andi %84, %88 : vector<32x1xi1>
    %cst_24 = arith.constant 0.000000e+00 : f32
    %90 = vector.shape_cast %89 : vector<32x1xi1> to vector<32x1xi1>
    %91 = vector.broadcast %90 : vector<32x1xi1> to vector<32x128xi1>
    %92 = vector.broadcast %cst_24 : f32 to vector<32x128xf32>
    %93 = arith.select %91, %80, %92 : vector<32x128xi1>, vector<32x128xf32>
    %94 = vector.extract_strided_slice %18 {offsets = [4, 0], sizes = [1, 128], strides = [1, 1]} : vector<7x128xf32> to vector<1x128xf32>
    %95 = vector.broadcast %94 : vector<1x128xf32> to vector<32x128xf32>
    %96 = arith.mulf %93, %95 : vector<32x128xf32>
    %97 = arith.addf %79, %96 : vector<32x128xf32>
    %c30_i32 = arith.constant 30 : i32
    %98 = tpu.dynamic_rotate %0 by %c30_i32 dim 0 : vector<32x128xf32>, i32 -> vector<32x128xf32>
    %c2_i32_25 = arith.constant 2 : i32
    %99 = vector.broadcast %c2_i32_25 : i32 to vector<32x1xi32>
    %100 = arith.addi %17, %99 : vector<32x1xi32>
    %c0_i32_26 = arith.constant 0 : i32
    %101 = vector.broadcast %c0_i32_26 : i32 to vector<32x1xi32>
    %102 = arith.cmpi sge, %100, %101 : vector<32x1xi32>
    %c2_i32_27 = arith.constant 2 : i32
    %103 = vector.broadcast %c2_i32_27 : i32 to vector<32x1xi32>
    %104 = arith.addi %17, %103 : vector<32x1xi32>
    %c16_i32_28 = arith.constant 16 : i32
    %105 = vector.broadcast %c16_i32_28 : i32 to vector<32x1xi32>
    %106 = arith.cmpi slt, %104, %105 : vector<32x1xi32>
    %107 = arith.andi %102, %106 : vector<32x1xi1>
    %cst_29 = arith.constant 0.000000e+00 : f32
    %108 = vector.shape_cast %107 : vector<32x1xi1> to vector<32x1xi1>
    %109 = vector.broadcast %108 : vector<32x1xi1> to vector<32x128xi1>
    %110 = vector.broadcast %cst_29 : f32 to vector<32x128xf32>
    %111 = arith.select %109, %98, %110 : vector<32x128xi1>, vector<32x128xf32>
    %112 = vector.extract_strided_slice %18 {offsets = [5, 0], sizes = [1, 128], strides = [1, 1]} : vector<7x128xf32> to vector<1x128xf32>
    %113 = vector.broadcast %112 : vector<1x128xf32> to vector<32x128xf32>
    %114 = arith.mulf %111, %113 : vector<32x128xf32>
    %115 = arith.addf %97, %114 : vector<32x128xf32>
    %c29_i32 = arith.constant 29 : i32
    %116 = tpu.dynamic_rotate %0 by %c29_i32 dim 0 : vector<32x128xf32>, i32 -> vector<32x128xf32>
    %c3_i32_30 = arith.constant 3 : i32
    %117 = vector.broadcast %c3_i32_30 : i32 to vector<32x1xi32>
    %118 = arith.addi %17, %117 : vector<32x1xi32>
    %c0_i32_31 = arith.constant 0 : i32
    %119 = vector.broadcast %c0_i32_31 : i32 to vector<32x1xi32>
    %120 = arith.cmpi sge, %118, %119 : vector<32x1xi32>
    %c3_i32_32 = arith.constant 3 : i32
    %121 = vector.broadcast %c3_i32_32 : i32 to vector<32x1xi32>
    %122 = arith.addi %17, %121 : vector<32x1xi32>
    %c16_i32_33 = arith.constant 16 : i32
    %123 = vector.broadcast %c16_i32_33 : i32 to vector<32x1xi32>
    %124 = arith.cmpi slt, %122, %123 : vector<32x1xi32>
    %125 = arith.andi %120, %124 : vector<32x1xi1>
    %cst_34 = arith.constant 0.000000e+00 : f32
    %126 = vector.shape_cast %125 : vector<32x1xi1> to vector<32x1xi1>
    %127 = vector.broadcast %126 : vector<32x1xi1> to vector<32x128xi1>
    %128 = vector.broadcast %cst_34 : f32 to vector<32x128xf32>
    %129 = arith.select %127, %116, %128 : vector<32x128xi1>, vector<32x128xf32>
    %130 = vector.extract_strided_slice %18 {offsets = [6, 0], sizes = [1, 128], strides = [1, 1]} : vector<7x128xf32> to vector<1x128xf32>
    %131 = vector.broadcast %130 : vector<1x128xf32> to vector<32x128xf32>
    %132 = arith.mulf %129, %131 : vector<32x128xf32>
    %133 = arith.addf %115, %132 : vector<32x128xf32>
    %134 = arith.truncf %133 : vector<32x128xf32> to vector<32x128xbf16>
    %c0_35 = arith.constant 0 : index
    %c0_36 = arith.constant 0 : index
    %135 = vector.load %arg4[%c0_35, %c0_36] : memref<128x128xbf16, #tpu.memory_space<vmem>>, vector<128x128xbf16>
    %cst_37 = arith.constant dense<0.000000e+00> : vector<32x128xf32>
    %136 = tpu.matmul %134, %135, %cst_37 {dimension_numbers = #tpu.dot_dimension_numbers<[1], [0], [0], [1], [0, 0, 1, 1], [], []>} : vector<32x128xbf16>, vector<128x128xbf16>, vector<32x128xf32> -> vector<32x128xf32>
    %c0_38 = arith.constant 0 : index
    %c0_39 = arith.constant 0 : index
    %137 = vector.load %arg5[%c0_38, %c0_39] : memref<1x128xf32, #tpu.memory_space<vmem>>, vector<1x128xf32>
    %138 = vector.broadcast %137 : vector<1x128xf32> to vector<32x128xf32>
    %139 = arith.addf %136, %138 : vector<32x128xf32>
    %cst_40 = arith.constant 0.000000e+00 : f32
    %140 = vector.broadcast %cst_40 : f32 to vector<32x128xf32>
    %141 = arith.maximumf %139, %140 : vector<32x128xf32>
    %142 = arith.addf %141, %0 : vector<32x128xf32>
    %cst_41 = arith.constant dense<0.000000e+00> : vector<32xf32>
    %143 = vector.multi_reduction <add>, %142, %cst_41 [1] : vector<32x128xf32> to vector<32xf32>
    %144 = vector.shape_cast %143 : vector<32xf32> to vector<32x1xf32>
    %cst_42 = arith.constant 7.812500e-03 : f32
    %145 = vector.broadcast %cst_42 : f32 to vector<32x1xf32>
    %146 = arith.mulf %144, %145 : vector<32x1xf32>
    %147 = arith.mulf %142, %142 : vector<32x128xf32>
    %cst_43 = arith.constant dense<0.000000e+00> : vector<32xf32>
    %148 = vector.multi_reduction <add>, %147, %cst_43 [1] : vector<32x128xf32> to vector<32xf32>
    %149 = vector.shape_cast %148 : vector<32xf32> to vector<32x1xf32>
    %cst_44 = arith.constant 7.812500e-03 : f32
    %150 = vector.broadcast %cst_44 : f32 to vector<32x1xf32>
    %151 = arith.mulf %149, %150 : vector<32x1xf32>
    %152 = arith.mulf %146, %146 : vector<32x1xf32>
    %153 = arith.subf %151, %152 : vector<32x1xf32>
    %cst_45 = arith.constant 9.99999974E-6 : f32
    %154 = vector.broadcast %cst_45 : f32 to vector<32x1xf32>
    %155 = arith.addf %153, %154 : vector<32x1xf32>
    %156 = math.rsqrt %155 : vector<32x1xf32>
    %157 = vector.broadcast %146 : vector<32x1xf32> to vector<32x128xf32>
    %158 = arith.subf %142, %157 : vector<32x128xf32>
    %159 = vector.broadcast %156 : vector<32x1xf32> to vector<32x128xf32>
    %160 = arith.mulf %158, %159 : vector<32x128xf32>
    %c0_46 = arith.constant 0 : index
    %c0_47 = arith.constant 0 : index
    %161 = vector.load %arg6[%c0_46, %c0_47] : memref<1x128xf32, #tpu.memory_space<vmem>>, vector<1x128xf32>
    %162 = vector.broadcast %161 : vector<1x128xf32> to vector<32x128xf32>
    %163 = arith.mulf %160, %162 : vector<32x128xf32>
    %c0_48 = arith.constant 0 : index
    %c0_49 = arith.constant 0 : index
    %164 = vector.load %arg7[%c0_48, %c0_49] : memref<1x128xf32, #tpu.memory_space<vmem>>, vector<1x128xf32>
    %165 = vector.broadcast %164 : vector<1x128xf32> to vector<32x128xf32>
    %166 = arith.addf %163, %165 : vector<32x128xf32>
    %c0_50 = arith.constant 0 : index
    %c0_51 = arith.constant 0 : index
    %167 = vector.load %arg8[%c0_50, %c0_51] : memref<32x128xf32, #tpu.memory_space<vmem>>, vector<32x128xf32>
    tpu.vector_store %arg8[%c0_50, %c0_51], %166 {strides = array<i32>} : memref<32x128xf32, #tpu.memory_space<vmem>>, vector<32x128xf32>,
    return
  }
  func.func @transform_0(%arg0: i32) -> (i32, i32) {
    %c0_i32 = arith.constant 0 : i32
    %c0_i32_0 = arith.constant 0 : i32
    return %arg0, %c0_i32 : i32, i32
  }
  func.func @transform_1(%arg0: i32) -> (i32, i32) {
    %c0_i32 = arith.constant 0 : i32
    %c0_i32_0 = arith.constant 0 : i32
    %c0_i32_1 = arith.constant 0 : i32
    return %c0_i32, %c0_i32_0 : i32, i32
  }
  func.func @transform_2(%arg0: i32) -> (i32, i32) {
    %c0_i32 = arith.constant 0 : i32
    %c0_i32_0 = arith.constant 0 : i32
    %c0_i32_1 = arith.constant 0 : i32
    return %c0_i32, %c0_i32_0 : i32, i32
  }
  func.func @transform_3(%arg0: i32) -> (i32, i32) {
    %c0_i32 = arith.constant 0 : i32
    %c0_i32_0 = arith.constant 0 : i32
    %c0_i32_1 = arith.constant 0 : i32
    return %c0_i32, %c0_i32_0 : i32, i32
  }
  func.func @transform_4(%arg0: i32) -> (i32, i32) {
    %c0_i32 = arith.constant 0 : i32
    %c0_i32_0 = arith.constant 0 : i32
    %c0_i32_1 = arith.constant 0 : i32
    return %c0_i32, %c0_i32_0 : i32, i32
  }
  func.func @transform_5(%arg0: i32) -> (i32, i32) {
    %c0_i32 = arith.constant 0 : i32
    %c0_i32_0 = arith.constant 0 : i32
    %c0_i32_1 = arith.constant 0 : i32
    return %c0_i32, %c0_i32_0 : i32, i32
  }
  func.func @transform_6(%arg0: i32) -> (i32, i32) {
    %c0_i32 = arith.constant 0 : i32
    %c0_i32_0 = arith.constant 0 : i32
    %c0_i32_1 = arith.constant 0 : i32
    return %c0_i32, %c0_i32_0 : i32, i32
  }
  func.func @transform_7(%arg0: i32) -> (i32, i32) {
    %c0_i32 = arith.constant 0 : i32
    %c0_i32_0 = arith.constant 0 : i32
    return %arg0, %c0_i32 : i32, i32
  }
}

</mosaic_0001>

<bundles_post_ra>
// kernel: _lambda_.1
= control target key start
LH: loop header
LB: loop body
LE: loop exit
PB: predicated region body
PF: predicated region fallthrough
CT: control target
= control target key end

     0   :  { %12 = vsyncpa [#allocation3], 0  ;;  %s1187_s0 = inlined_call_operand.hbm [shape: f32[32,128], index: 0, kind: input, shape index: {}]   ;;  %s1188_s1 = inlined_call_operand.hbm [shape: f32[7,128], index: 1, kind: input, shape index: {}]   ;;  %s1189_s2 = inlined_call_operand.hbm [shape: f32[1,128], index: 2, kind: input, shape index: {}]   ;;  %s1190_s3 = inlined_call_operand.hbm [shape: bf16[128,128], index: 3, kind: input, shape index: {}]   ;;  %s1191_s4 = inlined_call_operand.vmem [shape: f32[1,128], index: 4, kind: input, shape index: {}]   ;;  %s1192_s5 = inlined_call_operand.vmem [shape: f32[1,128], index: 5, kind: input, shape index: {}]   ;;  %s1193_s6 = inlined_call_operand.vmem [shape: f32[1,128], index: 6, kind: input, shape index: {}]   ;;  %s1194_s7 = inlined_call_operand.hbm [shape: f32[32,128], index: 7, kind: output, shape index: {}]  }
   0x1   :  { %13 = vsyncpa [#allocation6], 0 }
   0x2   :  { %14 = vsyncpa [#allocation9], 0  ;;  %s34_s26 = sshll.u32 %s1188_s1, 4  ;;  %s35_s26 = int_to_ptr.hbm [resolvable:$true] %s34_s26 }
   0x3   :  { %15 = vsyncpa [#allocation4], 0  ;;  %s856_s27 = smov [#allocation5]   ;;  %s20_s8 = sshll.u32 %s1187_s0, 4  ;;  %s21_s8 = int_to_ptr.hbm [resolvable:$true] %s20_s8 }
   0x4   :  { %s36_s28 = sshll.u32 %s856_s27, 4  ;;  %s857_s9 = smov [#allocation2]   ;;  %s37_s28 = int_to_ptr.vmem [resolvable:$true] %s36_s28 }
   0x5   :  { %39 = dma.hbm_to_vmem [thread:$0]  %s35_s26, 128, %s37_s28, [#allocation6]  }
   0x6   :  { %s22_s10 = sshll.u32 %s857_s9, 4  ;;  %s858_s11 = smov 128   ;;  %s23_s10 = int_to_ptr.vmem [resolvable:$true] %s22_s10 }
   0x7   :  { %s859_s12 = smov 8   ;;  %s45_s14 = sshll.u32 %s1189_s2, 4  ;;  %s46_s14 = int_to_ptr.hbm [resolvable:$true] %s45_s14 }
   0x8   :  { %28 = dma.hbm_to_vmem [thread:$0]  %s21_s8, 512, %s23_s10, [#allocation3], %s858_s11, %s858_s11, %s859_s12  }
   0x9   :  { %s860_s15 = smov [#allocation7]   ;;  %s55_s18 = sshll.u32 %s1190_s3, 4  ;;  %s56_s18 = int_to_ptr.hbm [resolvable:$true] %s55_s18 }
   0xa   :  { %s47_s16 = sshll.u32 %s860_s15, 4  ;;  %s861_s19 = smov [#allocation8]   ;;  %s48_s16 = int_to_ptr.vmem [resolvable:$true] %s47_s16 }
   0xb   :  { %50 = dma.hbm_to_vmem [thread:$0]  %s46_s14, 16, %s48_s16, [#allocation6]  }
   0xc   :  { %s57_s20 = sshll.u32 %s861_s19, 4  ;;  %s862_s21 = smov 64   ;;  %s58_s20 = int_to_ptr.vmem [resolvable:$true] %s57_s20 }
   0xd   :  { %s863_s22 = smov 4  }
   0xe   :  { %63 = dma.hbm_to_vmem [thread:$0]  %s56_s18, 1024, %s58_s20, [#allocation9], %s862_s21, %s862_s21, %s863_s22  }
   0xf   :  { %848 = dma.done.wait [#allocation3], 512  }
  0x10   :  { %849 = vsyncadd [#allocation3], 4294966784 }
  0x11   :  { %850 = dma.done.wait [#allocation6], 144  }
  0x12   :  { %851 = vsyncadd [#allocation6], 4294967152 }
  0x13   :  { %852 = dma.done.wait [#allocation9], 1024  }
  0x14   :  { %853 = vsyncadd [#allocation9], 4294966272  ;;  %v90_v0 = vlaneseq  ;;  %v698_v8 = vld [vmem:[#allocation8 + $0x38] sm:$0xff]  ;;  %v697_v11 = vld [vmem:[#allocation8 + $0x30] sm:$0xff]  ;;  %s644_s28 = sshll.u32 %s1194_s7, 4  ;;  %s645_s28 = int_to_ptr.hbm [resolvable:$true] %s644_s28 }
  0x15   :  { %503 = vmatpush.bf16.msra.mxu0 %v698_v8  ;;  %699 = vmatpush.bf16.msra.mxu1 %v698_v8  ;;  %v933_v12 = vld [vmem:[#allocation2] sm:$0xff]  ;;  %v939_v15 = vld [vmem:[#allocation2 + $0x8] sm:$0xff]  ;;  %v941_v16 = vld [vmem:[#allocation2 + $0x18] sm:$0xff] }
  0x16   :  { %v920_v1 = vshrl.u32 %v90_v0, 7  ;;  %v148_v17 = vrot.slane %v933_v12, 5  ;;  %v194_v18 = vrot.slane %v933_v12, 6  ;;  %v240_v19 = vrot.slane %v933_v12, 7  ;;  %v696_v21 = vld [vmem:[#allocation8 + $0x28] sm:$0xff]  ;;  %v695_v44 = vld [vmem:[#allocation8 + $0x20] sm:$0xff] }
  0x17   :  { %v949_v22 = vld [vmem:[#allocation5] sm:$0x7f]  ;;  %v951_v23 = vld [vmem:[#allocation7] ss:$0 sm:$0xff]  ;;  %v149_v24 = vrot.slane %v939_v15, 5  ;;  %v151_v25 = vrot.slane %v941_v16, 5 }
  0x18   :  { %v92_v2 = vadd.s32 8, %v920_v1  ;;  %v99_v3 = vand.u32 15, %v920_v1  ;;  %vm152_vm0 = vcmp.lt.s32.totalorder %v920_v1, 3  ;;  %vm198_vm1 = vcmp.lt.s32.totalorder %v920_v1, 2  ;;  %v1003_v49 = vld [vmem:[#allocation2 + $0x10] sm:$0xff]  ;;  %v694_v61 = vld [vmem:[#allocation8 + $0x18] sm:$0xff] }
  0x19   :  { %vm244_vm3 = vcmp.lt.s32.totalorder %v920_v1, 1  ;;  %v928_v9 = vadd.s32 16, %v920_v1  ;;  %v931_v10 = vadd.s32 24, %v920_v1  ;;  %vm299_vm6 = vcmp.lt.s32.totalorder %v920_v1, 7  ;;  %504 = vmatpush.bf16.msra.mxu0 %v697_v11  ;;  %700 = vmatpush.bf16.msra.mxu1 %v697_v11 }
  0x1a   :  { %v106_v4 = vand.u32 15, %v92_v2  ;;  %v157_v5 = vadd.s32 4294967293, %v99_v3  ;;  %v203_v6 = vadd.s32 4294967294, %v99_v3  ;;  %v249_v7 = vadd.s32 4294967295, %v99_v3 }
  0x1b   :  { %v956_v26 = vperm.slane %v949_v22, 0  ;;  %v195_v27 = vrot.slane %v939_v15, 6  ;;  %v197_v28 = vrot.slane %v941_v16, 6  ;;  %v961_v29 = vperm.slane %v949_v22, 1 }
  0x1c   :  { %vm161_vm2 = vcmp.ge.s32.totalorder %v157_v5, 0  ;;  %vm207_vm4 = vcmp.ge.s32.totalorder %v203_v6, 0  ;;  %vm253_vm5 = vcmp.ge.s32.totalorder %v249_v7, 0  ;;  %v935_v13 = vadd.s32 1, %v106_v4 }
  0x1d   :  { %v937_v14 = vadd.s32 2, %v106_v4  ;;  %v947_v20 = vadd.s32 3, %v106_v4  ;;  %v241_v30 = vrot.slane %v939_v15, 7  ;;  %v243_v31 = vrot.slane %v941_v16, 7  ;;  %505 = vmatpush.bf16.msra.mxu0 %v696_v21  ;;  %701 = vmatpush.bf16.msra.mxu1 %v696_v21  ;;  %v693_v21 = vld [vmem:[#allocation8 + $0x10] sm:$0xff] }
  0x1e   :  { %vm345_vm7 = vcmp.lt.s32.totalorder %v920_v1, 6  ;;  %v155_v32 = vsel %vm152_vm0, %v148_v17, %v149_v24  ;;  %v156_v33 = vsel %vm152_vm0, %v151_v25, %v148_v17  ;;  %v201_v34 = vsel %vm198_vm1, %v194_v18, %v195_v27 }
  0x1f   :  { %v979_v35 = vperm.slane %v949_v22, 2  ;;  %v181_v36 = vsel %vm161_vm2, %v156_v33, 0.0  ;;  %v187_v37 = vmul.f32 %v956_v26, %v155_v32  ;;  %v202_v38 = vsel %vm198_vm1, %v197_v28, %v194_v18 }
  0x20   :  { %v233_v39 = vmul.f32 %v961_v29, %v201_v34  ;;  %v186_v40 = vmul.f32 %v956_v26, %v181_v36  ;;  %v227_v41 = vsel %vm207_vm4, %v202_v38, 0.0  ;;  %v247_v42 = vsel %vm244_vm3, %v240_v19, %v241_v30 }
  0x21   :  { %v248_v43 = vsel %vm244_vm3, %v243_v31, %v240_v19  ;;  %vm391_vm8 = vcmp.lt.s32.totalorder %v920_v1, 5  ;;  %v191_v45 = vadd.f32 %v951_v23, %v187_v37  ;;  %v232_v46 = vmul.f32 %v961_v29, %v227_v41  ;;  %506 = vmatpush.bf16.msra.mxu0 %v695_v44  ;;  %702 = vmatpush.bf16.msra.mxu1 %v695_v44 }
  0x22   :  { %v273_v47 = vsel %vm253_vm5, %v248_v43, 0.0  ;;  %v279_v48 = vmul.f32 %v979_v35, %v247_v42  ;;  %v190_v50 = vadd.f32 %v951_v23, %v186_v40  ;;  %v1008_v52 = vperm.slane %v949_v22, 3 }
  0x23   :  { %v278_v51 = vmul.f32 %v979_v35, %v273_v47  ;;  %v295_v53 = vrot.slane %v933_v12, 1  ;;  %v237_v54 = vadd.f32 %v233_v39, %v191_v45  ;;  %v296_v55 = vrot.slane %v939_v15, 1 }
  0x24   :  { %v297_v56 = vrot.slane %v1003_v49, 1  ;;  %vm313_vm9 = vcmp.lt.s32.totalorder %v935_v13, 16  ;;  %v236_v57 = vadd.f32 %v232_v46, %v190_v50  ;;  %v287_v58 = vmul.f32 %v1008_v52, %v933_v12  ;;  %v692_v46 = vld [vmem:[#allocation8 + $0x8] sm:$0xff] }
  0x25   :  { %v288_v59 = vmul.f32 %v1008_v52, %v939_v15  ;;  %v1019_v60 = vperm.slane %v949_v22, 4  ;;  %v283_v62 = vadd.f32 %v279_v48, %v237_v54  ;;  %v302_v0 = vsel %vm299_vm6, %v295_v53, %v296_v55  ;;  %507 = vmatpush.bf16.msra.mxu0 %v694_v61  ;;  %703 = vmatpush.bf16.msra.mxu1 %v694_v61 }
  0x26   :  { %v301_v63 = vsel %vm299_vm6, %v296_v55, %v297_v56  ;;  %v341_v2 = vrot.slane %v933_v12, 2  ;;  %v282_v3 = vadd.f32 %v278_v51, %v236_v57  ;;  %v342_v6 = vrot.slane %v939_v15, 2 }
  0x27   :  { %v329_v4 = vsel %vm313_vm9, %v301_v63, 0.0  ;;  %v333_v5 = vmul.f32 %v1019_v60, %v302_v0  ;;  %v292_v7 = vadd.f32 %v288_v59, %v283_v62  ;;  %v343_v11 = vrot.slane %v1003_v49, 2 }
  0x28   :  { %v334_v8 = vmul.f32 %v1019_v60, %v329_v4  ;;  %vm359_vm10 = vcmp.lt.s32.totalorder %v937_v14, 16  ;;  %v291_v13 = vadd.f32 %v287_v58, %v282_v3  ;;  %v348_v17 = vsel %vm345_vm7, %v341_v2, %v342_v6 }
  0x29   :  { %v1040_v18 = vperm.slane %v949_v22, 5  ;;  %v387_v19 = vrot.slane %v933_v12, 3  ;;  %v347_v14 = vsel %vm345_vm7, %v342_v6, %v343_v11  ;;  %v388_v33 = vrot.slane %v939_v15, 3  ;;  %508 = vmatpush.bf16.msra.mxu0 %v693_v21  ;;  %704 = vmatpush.bf16.msra.mxu1 %v693_v21 }
  0x2a   :  { %v338_v32 = vadd.f32 %v334_v8, %v292_v7  ;;  %v389_v34 = vrot.slane %v1003_v49, 3  ;;  %v337_v36 = vadd.f32 %v333_v5, %v291_v13  ;;  %v375_v37 = vsel %vm359_vm10, %v347_v14, 0.0 }
  0x2b   :  { %v379_v38 = vmul.f32 %v1040_v18, %v348_v17  ;;  %vm405_vm11 = vcmp.lt.s32.totalorder %v947_v20, 16  ;;  %v380_v39 = vmul.f32 %v1040_v18, %v375_v37  ;;  %v394_v41 = vsel %vm391_vm8, %v387_v19, %v388_v33 }
  0x2c   :  { %v393_v40 = vsel %vm391_vm8, %v388_v33, %v389_v34  ;;  %v1061_v42 = vperm.slane %v949_v22, 6  ;;  %v113_v45 = vand.u32 15, %v928_v9  ;;  %v1065_v20 = vand.u32 15, %v931_v10 }
  0x2d   :  { %v383_v43 = vadd.f32 %v379_v38, %v337_v36  ;;  %v421_v44 = vsel %vm405_vm11, %v393_v40, 0.0  ;;  %v384_v47 = vadd.f32 %v380_v39, %v338_v32  ;;  %v150_v51 = vrot.slane %v1003_v49, 5  ;;  %509 = vmatpush.bf16.msra.mxu0 %v692_v46  ;;  %705 = vmatpush.bf16.msra.mxu1 %v692_v46 }
  0x2e   :  { %v425_v48 = vmul.f32 %v1061_v42, %v394_v41  ;;  %v426_v50 = vmul.f32 %v1061_v42, %v421_v44  ;;  %v159_v54 = vadd.s32 4294967293, %v113_v45  ;;  %v196_v22 = vrot.slane %v1003_v49, 6 }
  0x2f   :  { %v205_v55 = vadd.s32 4294967294, %v113_v45  ;;  %v242_v57 = vrot.slane %v1003_v49, 7  ;;  %v153_v10 = vsel %vm152_vm0, %v150_v51, %v151_v25  ;;  %v154_v59 = vsel %vm152_vm0, %v149_v24, %v150_v51  ;;  %v691_v25 = vld [vmem:[#allocation8] sm:$0xff] }
  0x30   :  { %v429_v9 = vadd.f32 %v425_v48, %v383_v43  ;;  %v430_v58 = vadd.f32 %v426_v50, %v384_v47  ;;  %vm163_vm12 = vcmp.ge.s32.totalorder %v159_v54, 0  ;;  %v189_v61 = vmul.f32 %v956_v26, %v153_v10 }
  0x31   :  { %v199_v62 = vsel %vm198_vm1, %v196_v22, %v197_v28  ;;  %v200_v63 = vsel %vm198_vm1, %v195_v27, %v196_v22  ;;  %v183_v3 = vsel %vm163_vm12, %v154_v59, 0.0  ;;  %vm209_vm13 = vcmp.ge.s32.totalorder %v205_v55, 0  ;;  %510 = vmatpush.bf16.msra.mxu0 %v691_v25  ;;  %706 = vmatpush.bf16.msra.mxu1 %v691_v25 }
  0x32   :  { %v433_v0 = vpack.c.bf16 %v430_v58, %v429_v9  ;;  %v235_v24 = vmul.f32 %v961_v29, %v199_v62  ;;  %v188_v4 = vmul.f32 %v956_v26, %v183_v3  ;;  %v193_v5 = vadd.f32 %v951_v23, %v189_v61 }
  0x33   :  { %v229_v6 = vsel %vm209_vm13, %v200_v63, 0.0  ;;  %v245_v28 = vsel %vm244_vm3, %v242_v57, %v243_v31  ;;  %v246_v7 = vsel %vm244_vm3, %v241_v30, %v242_v57  ;;  %v251_v8 = vadd.s32 4294967295, %v113_v45 }
  0x34   :  { %v234_v27 = vmul.f32 %v961_v29, %v229_v6  ;;  %v281_v13 = vmul.f32 %v979_v35, %v245_v28  ;;  %v192_v26 = vadd.f32 %v951_v23, %v188_v4  ;;  %v239_v17 = vadd.f32 %v235_v24, %v193_v5  ;;  %511 = vmatmul.bf16.vlgmr.msra.gmra.mxu0 %v433_v0 }
  0x35   :  { %v289_v21 = vmul.f32 %v1008_v52, %v1003_v49  ;;  %v290_v32 = vmul.f32 %v1008_v52, %v941_v16  ;;  %vm255_vm14 = vcmp.ge.s32.totalorder %v251_v8, 0  ;;  %v298_v29 = vrot.slane %v941_v16, 1 }
  0x36   :  { %v307_v31 = vadd.s32 1, %v1065_v20  ;;  %v344_v30 = vrot.slane %v941_v16, 2  ;;  %v238_v14 = vadd.f32 %v234_v27, %v192_v26  ;;  %v275_v33 = vsel %vm255_vm14, %v246_v7, 0.0 }
  0x37   :  { %v285_v36 = vadd.f32 %v281_v13, %v239_v17  ;;  %v353_v23 = vadd.s32 2, %v1065_v20  ;;  %v280_v37 = vmul.f32 %v979_v35, %v275_v33  ;;  %v300_v52 = vsel %vm299_vm6, %v297_v56, %v298_v29 }
  0x38   :  { %v303_v38 = vsel %vm299_vm6, %v298_v29, %v295_v53  ;;  %vm315_vm15 = vcmp.lt.s32.totalorder %v307_v31, 16  ;;  %v335_v41 = vmul.f32 %v1019_v60, %v300_v52  ;;  %v346_v35 = vsel %vm345_vm7, %v343_v11, %v344_v30 }
  0x39   :  { %v294_v39 = vadd.f32 %v290_v32, %v285_v36  ;;  %v331_v40 = vsel %vm315_vm15, %v303_v38, 0.0  ;;  %v284_v43 = vadd.f32 %v280_v37, %v238_v14  ;;  %v349_v56 = vsel %vm345_vm7, %v344_v30, %v341_v2 }
  0x3a   :  { %v336_v44 = vmul.f32 %v1019_v60, %v331_v40  ;;  %vm361_vm0 = vcmp.lt.s32.totalorder %v353_v23, 16  ;;  %v390_v45 = vrot.slane %v941_v16, 3  ;;  %v399_v46 = vadd.s32 3, %v1065_v20 }
  0x3b   :  { %v377_v53 = vsel %vm361_vm0, %v349_v56, 0.0  ;;  %v293_v47 = vadd.f32 %v289_v21, %v284_v43  ;;  %v381_v50 = vmul.f32 %v1040_v18, %v346_v35 }
  0x3c   :  { %v340_v48 = vadd.f32 %v336_v44, %v294_v39  ;;  %v382_v11 = vmul.f32 %v1040_v18, %v377_v53  ;;  %v392_v60 = vsel %vm391_vm8, %v389_v34, %v390_v45  ;;  %v395_v2 = vsel %vm391_vm8, %v390_v45, %v387_v19  ;;  %v717_v34 = vld [vmem:[%s1191_s4] ss:$0 sm:$0xff] }
  0x3d   :  { %vm407_vm1 = vcmp.lt.s32.totalorder %v399_v46, 16  ;;  %v339_v51 = vadd.f32 %v335_v41, %v293_v47  ;;  %v427_v22 = vmul.f32 %v1061_v42, %v392_v60 }
  0x3e   :  { %v386_v54 = vadd.f32 %v382_v11, %v340_v48  ;;  %v423_v20 = vsel %vm407_vm1, %v395_v2, 0.0  ;;  %v718_v11 = vld [vmem:[%s1192_s5] ss:$0 sm:$0xff]  ;;  %s864_s5 = smov [#allocation10]  }
  0x3f   :  { %v428_v55 = vmul.f32 %v1061_v42, %v423_v20  ;;  %v385_v57 = vadd.f32 %v381_v50, %v339_v51  ;;  %v719_v20 = vld [vmem:[%s1193_s6] ss:$0 sm:$0xff]  ;;  %s642_s6 = sshll.u32 %s864_s5, 4  ;;  %s643_s6 = int_to_ptr.vmem [resolvable:$true] %s642_s6 }
  0x41   :  { %v432_v18 = vadd.f32 %v428_v55, %v386_v54  ;;  %v431_v9 = vadd.f32 %v427_v22, %v385_v57 }
  0x43   :  { %v434_v58 = vpack.c.bf16 %v432_v18, %v431_v9 }
  0x45   :  { %516 = vmatmul.bf16.vlgmr.msra.gmra.mxu1 %v434_v58 }
  0xb1   :  { %v512_v10 = vpop.f32.mrf.mxu0 }
  0xb2   :  { %v513_v1 = vadd.f32 %v717_v34, %v512_v10 }
  0xb4   :  { %v522_v19 = vmax.f32 %v513_v1, 0.0 }
  0xb6   :  { %v1148_v59 = vadd.f32 %v522_v19, %v933_v12 }
  0xb8   :  { %530 = vadd.xlane.f32.xlu0 %v1148_v59  ;;  %v542_v42 = vmul.f32 %v1148_v59, %v1148_v59 }
  0xb9   :  { %v514_v61 = vpop.f32.mrf.mxu0 }
  0xba   :  { %v515_v62 = vadd.f32 %v717_v34, %v514_v61  ;;  %546 = vadd.xlane.f32.xlu2 %v542_v42 }
  0xbc   :  { %v523_v63 = vmax.f32 %v515_v62, 0.0 }
  0xbe   :  { %v1154_v0 = vadd.f32 %v523_v63, %v939_v15 }
  0xc0   :  { %532 = vadd.xlane.f32.xlu0 %v1154_v0  ;;  %v543_v12 = vmul.f32 %v1154_v0, %v1154_v0 }
  0xc2   :  { %v517_v25 = vpop.f32.mrf.mxu1  ;;  %548 = vadd.xlane.f32.xlu2 %v543_v12 }
  0xc3   :  { %v518_v3 = vadd.f32 %v717_v34, %v517_v25 }
  0xc5   :  { %v524_v24 = vmax.f32 %v518_v3, 0.0 }
  0xc7   :  { %v1160_v4 = vadd.f32 %v524_v24, %v1003_v49 }
  0xc9   :  { %534 = vadd.xlane.f32.xlu1 %v1160_v4  ;;  %v544_v6 = vmul.f32 %v1160_v4, %v1160_v4 }
  0xca   :  { %v519_v5 = vpop.f32.mrf.mxu1 }
  0xcb   :  { %v520_v28 = vadd.f32 %v717_v34, %v519_v5  ;;  %550 = vadd.xlane.f32.xlu0 %v544_v6 }
  0xcd   :  { %v525_v15 = vmax.f32 %v520_v28, 0.0 }
  0xcf   :  { %v1166_v27 = vadd.f32 %v525_v15, %v941_v16 }
  0xd1   :  { %536 = vadd.xlane.f32.xlu1 %v1166_v27  ;;  %v545_v7 = vmul.f32 %v1166_v27, %v1166_v27 }
  0xd9   :  { %552 = vadd.xlane.f32.xlu1 %v545_v7 }
 0x12b   :  { %v531_v49 = vpop.xlane.xlu0 %530 }
 0x12c   :  { %v538_v8 = vmul.f32 0.0078125, %v531_v49 }
 0x12d   :  { %v547_v13 = vpop.xlane.xlu2 %546 }
 0x12e   :  { %v558_v26 = vmul.f32 %v538_v8, %v538_v8  ;;  %v554_v17 = vmul.f32 0.0078125, %v547_v13  ;;  %v610_v50 = vsub.f32 %v1148_v59, %v538_v8 }
 0x130   :  { %v562_v21 = vsub.f32 %v554_v17, %v558_v26 }
 0x132   :  { %v566_v32 = vadd.f32 1e-05, %v562_v21 }
 0x133   :  { %v533_v29 = vpop.xlane.xlu0 %532 }
 0x134   :  { %720 = vrsqrt.f32 %v566_v32  ;;  %v539_v31 = vmul.f32 0.0078125, %v533_v29  ;;  %vm576_vm3 = vweird.f32 %v566_v32 }
 0x135   :  { %v549_v30 = vpop.xlane.xlu2 %548 }
 0x136   :  { %v559_v14 = vmul.f32 %v539_v31, %v539_v31  ;;  %v555_v16 = vmul.f32 0.0078125, %v549_v30  ;;  %v611_v61 = vsub.f32 %v1154_v0, %v539_v31 }
 0x138   :  { %v563_v36 = vsub.f32 %v555_v16, %v559_v14 }
 0x13a   :  { %v721_v37 = vpop.eup %720  ;;  %v567_v52 = vadd.f32 1e-05, %v563_v36 }
 0x13b   :  { %v571_v38 = vmul.f32 %v721_v37, %v566_v32  ;;  %vm577_vm2 = vweird.f32 %v721_v37 }
 0x13c   :  { %v535_v33 = vpop.xlane.xlu1 %534  ;;  %722 = vrsqrt.f32 %v567_v52  ;;  %vm578_vm4 = vmor %vm576_vm3, %vm577_vm2  ;;  %vm586_vm6 = vweird.f32 %v567_v52 }
 0x13d   :  { %v540_v23 = vmul.f32 0.0078125, %v535_v33  ;;  %v572_v35 = vmul.f32 %v721_v37, %v571_v38 }
 0x13e   :  { %v551_v39 = vpop.xlane.xlu0 %550 }
 0x13f   :  { %v560_v40 = vmul.f32 %v540_v23, %v540_v23  ;;  %v556_v41 = vmul.f32 0.0078125, %v551_v39  ;;  %v573_v44 = vmul.f32 0.5, %v572_v35  ;;  %v612_v6 = vsub.f32 %v1160_v4, %v540_v23 }
 0x141   :  { %v564_v43 = vsub.f32 %v556_v41, %v560_v40  ;;  %v574_v45 = vsub.f32 1.5, %v573_v44 }
 0x142   :  { %v723_v46 = vpop.eup %722 }
 0x143   :  { %v568_v53 = vadd.f32 1e-05, %v564_v43  ;;  %v575_v47 = vmul.f32 %v721_v37, %v574_v45  ;;  %v581_v48 = vmul.f32 %v723_v46, %v567_v52  ;;  %vm587_vm5 = vweird.f32 %v723_v46 }
 0x144   :  { %v537_v56 = vpop.xlane.xlu1 %536  ;;  %vm588_vm7 = vmor %vm586_vm6, %vm587_vm5 }
 0x145   :  { %724 = vrsqrt.f32 %v568_v53  ;;  %v541_v60 = vmul.f32 0.0078125, %v537_v56  ;;  %v579_v2 = vsel %vm578_vm4, %v721_v37, %v575_v47  ;;  %v582_v51 = vmul.f32 %v723_v46, %v581_v48 }
 0x146   :  { %v614_v54 = vmul.f32 %v610_v50, %v579_v2  ;;  %vm596_vm9 = vweird.f32 %v568_v53 }
 0x147   :  { %v583_v22 = vmul.f32 0.5, %v582_v51  ;;  %v561_v18 = vmul.f32 %v541_v60, %v541_v60  ;;  %v613_v29 = vsub.f32 %v1166_v27, %v541_v60 }
 0x148   :  { %v622_v57 = vmul.f32 %v718_v11, %v614_v54 }
 0x149   :  { %v584_v58 = vsub.f32 1.5, %v583_v22 }
 0x14a   :  { %v630_v1 = vadd.f32 %v719_v20, %v622_v57 }
 0x14b   :  { %v725_v55 = vpop.eup %724  ;;  %v585_v19 = vmul.f32 %v723_v46, %v584_v58 }
 0x14c   :  { %v553_v9 = vpop.xlane.xlu1 %552  ;;  %v591_v10 = vmul.f32 %v725_v55, %v568_v53  ;;  %634 = vst [vmem:[#allocation10] sm:$0xff] %v630_v1  ;;  %vm597_vm8 = vweird.f32 %v725_v55 }
 0x14d   :  { %v557_v34 = vmul.f32 0.0078125, %v553_v9  ;;  %v589_v62 = vsel %vm588_vm7, %v723_v46, %v585_v19  ;;  %vm598_vm10 = vmor %vm596_vm9, %vm597_vm8 }
 0x14e   :  { %v592_v42 = vmul.f32 %v725_v55, %v591_v10  ;;  %v615_v3 = vmul.f32 %v611_v61, %v589_v62 }
 0x14f   :  { %v565_v59 = vsub.f32 %v557_v34, %v561_v18 }
 0x150   :  { %v593_v25 = vmul.f32 0.5, %v592_v42  ;;  %v623_v24 = vmul.f32 %v718_v11, %v615_v3 }
 0x151   :  { %v569_v63 = vadd.f32 1e-05, %v565_v59 }
 0x152   :  { %v594_v12 = vsub.f32 1.5, %v593_v25  ;;  %v631_v28 = vadd.f32 %v719_v20, %v623_v24 }
 0x153   :  { %726 = vrsqrt.f32 %v569_v63  ;;  %vm606_vm12 = vweird.f32 %v569_v63 }
 0x154   :  { %v595_v5 = vmul.f32 %v725_v55, %v594_v12  ;;  %635 = vst [vmem:[#allocation10 + $0x8] sm:$0xff] %v631_v28 }
 0x156   :  { %v599_v15 = vsel %vm598_vm10, %v725_v55, %v595_v5 }
 0x157   :  { %v616_v7 = vmul.f32 %v612_v6, %v599_v15 }
 0x159   :  { %v727_v0 = vpop.eup %726  ;;  %v624_v8 = vmul.f32 %v718_v11, %v616_v7 }
 0x15a   :  { %v601_v49 = vmul.f32 %v727_v0, %v569_v63  ;;  %vm607_vm11 = vweird.f32 %v727_v0 }
 0x15b   :  { %v632_v26 = vadd.f32 %v719_v20, %v624_v8  ;;  %vm608_vm13 = vmor %vm606_vm12, %vm607_vm11 }
 0x15c   :  { %v602_v13 = vmul.f32 %v727_v0, %v601_v49 }
 0x15d   :  { %636 = vst [vmem:[#allocation10 + $0x10] sm:$0xff] %v632_v26 }
 0x15e   :  { %v603_v17 = vmul.f32 0.5, %v602_v13 }
 0x160   :  { %v604_v21 = vsub.f32 1.5, %v603_v17 }
 0x162   :  { %v605_v32 = vmul.f32 %v727_v0, %v604_v21 }
 0x164   :  { %v609_v4 = vsel %vm608_vm13, %v727_v0, %v605_v32 }
 0x165   :  { %v617_v31 = vmul.f32 %v613_v29, %v609_v4 }
 0x167   :  { %v625_v30 = vmul.f32 %v718_v11, %v617_v31 }
 0x169   :  { %v633_v14 = vadd.f32 %v719_v20, %v625_v30 }
 0x16b   :  { %637 = vst [vmem:[#allocation10 + $0x18] sm:$0xff] %v633_v14 }
 0x16c   :  { %650 = dma.vmem_to_hbm [thread:$0]  %s643_s6, 512, %s645_s28, [#allocation4], %s858_s11, %s858_s11, %s859_s12  }
 0x16d   :  { %854 = dma.done.wait [#allocation4], 512  }
 0x16e   :  { %855 = vsyncadd [#allocation4], 4294966784 }
 0x16f   :  { %655 = vsyncpa [#allocation3], 1 }
 0x170   :  { %656 = vsyncpa [#allocation6], 1 }
 0x171   :  { %657 = vsyncpa [#allocation9], 1 }
 0x172   :  { %658 = vsyncpa [#allocation4], 1 }

</bundles_post_ra>
